<compile_context>
chip_gen: v6e
topology: v6e:2x2x1
jax: 0.10.0
libtpu: 0.0.40
codegen_flags: <defaults>
</compile_context>

<pallas_src>
import functools

import jax
import jax.numpy as jnp
from jax.experimental import pallas as pl
from jax.experimental.pallas import tpu as pltpu

N_EMBD = 32
BLOCK_SIZE = 8      # sequence length T
WINDOW_SIZE = 3
NEG_INF = -1e30


def swa_kernel(x_ref, wqkv_ref, o_ref, *, seq_len, d_head, window_size):
    T, D = seq_len, d_head
    rows, E = x_ref.shape          # rows = tile_b * T
    TB = rows // T
    scale = float(D) ** -0.5

    # Fused Q/K/V projection: one (TB*T, E) @ (E, 3D) MXU matmul.
    qkv = jnp.dot(x_ref[...], wqkv_ref[...], preferred_element_type=jnp.float32)
    q = qkv[:, :D].reshape(TB, T, D)
    k = qkv[:, D:2 * D].reshape(TB, T, D)
    v = qkv[:, 2 * D:].reshape(TB, T, D)

    # Batched attention scores: (TB, T, T).
    scores = jnp.einsum('bqd,bkd->bqk', q, k,
                        preferred_element_type=jnp.float32) * scale

    # Causal + sliding-window mask, built from in-kernel 2-D iotas (no HBM
    # input / DMA for the mask).
    row = jax.lax.broadcasted_iota(jnp.int32, (T, T), 0)
    col = jax.lax.broadcasted_iota(jnp.int32, (T, T), 1)
    allowed = (col <= row) & (col > row - window_size)
    scores = jnp.where(allowed[None, :, :], scores, NEG_INF)

    # Numerically stable softmax over keys (diagonal always allowed, so the
    # denominator is never zero).  Reciprocal goes to the EUP slot; full
    # precision keeps the 1e-4 reference tolerance.
    m = jnp.max(scores, axis=-1, keepdims=True)
    p = jnp.exp(scores - m)
    denom = jnp.sum(p, axis=-1, keepdims=True)
    weights = p * pl.reciprocal(denom, approx=False)

    # Dropout on the attention weights: identity in eval mode.
    out = jnp.einsum('bqk,bkd->bqd', weights, v,
                     preferred_element_type=jnp.float32).astype(o_ref.dtype)

    # Lane-dense output store: o_ref block is (tile_b, 1, T*D) = 128 lanes.
    # One static lane-offset slice store per query position (robust lowering;
    # avoids a minor-dim-merging value reshape).
    for q_pos in range(T):
        o_ref[:, :, q_pos * D:(q_pos + 1) * D] = out[:, q_pos:q_pos + 1, :]


def swa_forward(x, wqkv, d_head, *, window_size=WINDOW_SIZE, tile_b=256):
    """x: (B, T, n_embd) f32, wqkv: (n_embd, 3*d_head) f32 -> (B, T, d_head)."""
    B, T, E = x.shape
    assert wqkv.shape == (E, 3 * d_head)

    # Keep >= 2 grid steps whenever B >= 2 so v7x shards the batch axis across
    # both TensorCores; tile_b=256 keeps the per-step VMEM footprint at a few
    # hundred KiB (well under the 32 MiB scoped default, even on v7x's 64 MiB).
    tile_b = int(max(1, min(tile_b, pl.cdiv(B, 2))))
    num_tiles = pl.cdiv(B, tile_b)

    # Free, metadata-only reshape so the fused projection operand arrives in
    # matmul shape with zero in-kernel cost.
    x_flat = x.reshape(B * T, E)

    kernel = functools.partial(swa_kernel, seq_len=T, d_head=d_head,
                               window_size=window_size)

    flops = 2 * B * T * (E * 3 * d_head + 2 * T * d_head)
    bytes_accessed = 4 * (B * T * E + E * 3 * d_head + B * T * d_head)
    transcendentals = B * T * T

    out = pl.pallas_call(
        kernel,
        out_shape=jax.ShapeDtypeStruct((B, 1, T * d_head), x.dtype),
        grid_spec=pltpu.PrefetchScalarGridSpec(
            num_scalar_prefetch=0,
            grid=(num_tiles,),
            in_specs=[
                pl.BlockSpec((tile_b * T, E), lambda i: (i, 0)),     # x rows
                pl.BlockSpec((E, 3 * d_head), lambda i: (0, 0)),     # fused Wqkv
            ],
            out_specs=pl.BlockSpec((tile_b, 1, T * d_head),
                                   lambda i: (i, 0, 0)),
        ),
        compiler_params=pltpu.CompilerParams(
            dimension_semantics=("parallel",)),
        cost_estimate=pl.CostEstimate(flops=flops,
                                      transcendentals=transcendentals,
                                      bytes_accessed=bytes_accessed),
    )(x_flat, wqkv)

    # Free reshape back to (B, T, d_head); no slicing / extra HBM pass.
    return out.reshape(B, T, d_head)


def swa_ref(x, wq, wk, wv, d_head, window_size):
    """Pure-JAX reference (intended SWA semantics) for correctness checking."""
    q = x @ wq
    k = x @ wk
    v = x @ wv
    scores = jnp.einsum('bqd,bkd->bqk', q, k) * float(d_head) ** -0.5
    T = x.shape[1]
    idx = jnp.arange(T)
    allowed = (idx[None, :] <= idx[:, None]) & (idx[None, :] > idx[:, None] - window_size)
    scores = jnp.where(allowed[None, :, :], scores, NEG_INF)
    w = jax.nn.softmax(scores, axis=-1)
    return jnp.einsum('bqk,bkd->bqd', w, v)


if __name__ == "__main__":
    key = jax.random.PRNGKey(0)
    k_x, k_q, k_k, k_v = jax.random.split(key, 4)

    B, T, d_head = 2, BLOCK_SIZE, 16
    x = jax.random.normal(k_x, (B, T, N_EMBD), jnp.float32)

    # Bias-free Linear(n_embd -> d_head) weights, stored (in, out) for x @ W.
    bound = 1.0 / jnp.sqrt(N_EMBD)
    wq = jax.random.uniform(k_q, (N_EMBD, d_head), jnp.float32, -bound, bound)
    wk = jax.random.uniform(k_k, (N_EMBD, d_head), jnp.float32, -bound, bound)
    wv = jax.random.uniform(k_v, (N_EMBD, d_head), jnp.float32, -bound, bound)
    wqkv = jnp.concatenate([wq, wk, wv], axis=1)          # fused (E, 3*d_head)

    out = swa_forward(x, wqkv, d_head)
    out = jax.block_until_ready(out)

    ref = swa_ref(x, wq, wk, wv, d_head, WINDOW_SIZE)
    assert out.shape == (B, T, d_head)
    assert jnp.allclose(out, ref, atol=1e-4, rtol=1e-4), "mismatch vs reference"

    print("KERNEL_OK")
</pallas_src>

<mosaic_0001>
module attributes {stable_mosaic.version = 11 : i64} {
  func.func @swa_kernel(%arg0: i32, %arg1: memref<8x32xf32, #tpu.memory_space<vmem>>, %arg2: memref<32x48xf32, #tpu.memory_space<vmem>>, %arg3: memref<1x1x128xf32, #tpu.memory_space<vmem>>) attributes {dimension_semantics = [#tpu.dimension_semantics<parallel>], iteration_bounds = array<i64: 2>, scalar_prefetch = 0 : i64, scratch_operands = 0 : i64, tpu.core_type = #tpu.core_type<tc>, window_params = [{transform_indices = @transform_0, window_bounds = array<i64: 8, 32>}, {pipeline_mode = #tpu.pipeline_mode<synchronous>, transform_indices = @transform_1, window_bounds = array<i64: 32, 48>}, {transform_indices = @transform_2, window_bounds = array<i64: 1, 1, 128>}]} {
    %c0 = arith.constant 0 : index
    %c0_0 = arith.constant 0 : index
    %0 = vector.load %arg1[%c0, %c0_0] : memref<8x32xf32, #tpu.memory_space<vmem>>, vector<8x32xf32>
    %c0_1 = arith.constant 0 : index
    %c0_2 = arith.constant 0 : index
    %1 = vector.load %arg2[%c0_1, %c0_2] : memref<32x48xf32, #tpu.memory_space<vmem>>, vector<32x48xf32>
    %cst = arith.constant dense<0.000000e+00> : vector<8x48xf32>
    %2 = tpu.matmul %0, %1, %cst {dimension_numbers = #tpu.dot_dimension_numbers<[1], [0], [0], [1], [0, 0, 1, 1], [], []>} : vector<8x32xf32>, vector<32x48xf32>, vector<8x48xf32> -> vector<8x48xf32>
    %3 = vector.extract_strided_slice %2 {offsets = [0, 0], sizes = [8, 16], strides = [1, 1]} : vector<8x48xf32> to vector<8x16xf32>
    %4 = vector.shape_cast %3 : vector<8x16xf32> to vector<1x8x16xf32>
    %5 = vector.extract_strided_slice %2 {offsets = [0, 16], sizes = [8, 16], strides = [1, 1]} : vector<8x48xf32> to vector<8x16xf32>
    %6 = vector.shape_cast %5 : vector<8x16xf32> to vector<1x8x16xf32>
    %7 = vector.extract_strided_slice %2 {offsets = [0, 32], sizes = [8, 16], strides = [1, 1]} : vector<8x48xf32> to vector<8x16xf32>
    %8 = vector.shape_cast %7 : vector<8x16xf32> to vector<1x8x16xf32>
    "tpu.trace_start"() <{level = 10 : i32, message = "bqd,bkd->bqk"}> : () -> ()
    %cst_3 = arith.constant dense<0.000000e+00> : vector<1x8x8xf32>
    %9 = tpu.matmul %4, %6, %cst_3 {dimension_numbers = #tpu.dot_dimension_numbers<[2], [2], [1], [1], [0, 0, 0, 1, 1, 1], [0], [0]>} : vector<1x8x16xf32>, vector<1x8x16xf32>, vector<1x8x8xf32> -> vector<1x8x8xf32>
    "tpu.trace_stop"() : () -> ()
    %cst_4 = arith.constant 2.500000e-01 : f32
    %10 = vector.broadcast %cst_4 : f32 to vector<1x8x8xf32>
    %11 = arith.mulf %9, %10 : vector<1x8x8xf32>
    %12 = tpu.iota {dimensions = array<i32: 0>} : vector<8x8xi32>
    %13 = tpu.iota {dimensions = array<i32: 1>} : vector<8x8xi32>
    %14 = arith.cmpi sle, %13, %12 : vector<8x8xi32>
    %c3_i32 = arith.constant 3 : i32
    %15 = vector.broadcast %c3_i32 : i32 to vector<8x8xi32>
    %16 = arith.subi %12, %15 : vector<8x8xi32>
    %17 = arith.cmpi sgt, %13, %16 : vector<8x8xi32>
    %18 = arith.andi %14, %17 : vector<8x8xi1>
    %19 = vector.shape_cast %18 : vector<8x8xi1> to vector<1x8x8xi1>
    %cst_5 = arith.constant -1.000000e+30 : f32
    %20 = vector.broadcast %cst_5 : f32 to vector<1x8x8xf32>
    %21 = arith.select %19, %11, %20 : vector<1x8x8xi1>, vector<1x8x8xf32>
    %cst_6 = arith.constant dense<0xFF800000> : vector<1x8xf32>
    %22 = vector.multi_reduction <maximumf>, %21, %cst_6 [2] : vector<1x8x8xf32> to vector<1x8xf32>
    %23 = vector.shape_cast %22 : vector<1x8xf32> to vector<1x8x1xf32>
    %24 = vector.broadcast %23 : vector<1x8x1xf32> to vector<1x8x8xf32>
    %25 = arith.subf %21, %24 : vector<1x8x8xf32>
    %26 = math.exp %25 : vector<1x8x8xf32>
    %cst_7 = arith.constant dense<0.000000e+00> : vector<1x8xf32>
    %27 = vector.multi_reduction <add>, %26, %cst_7 [2] : vector<1x8x8xf32> to vector<1x8xf32>
    %28 = vector.shape_cast %27 : vector<1x8xf32> to vector<1x8x1xf32>
    %29 = tpu.reciprocal %28 : vector<1x8x1xf32> -> vector<1x8x1xf32>
    %30 = vector.broadcast %29 : vector<1x8x1xf32> to vector<1x8x8xf32>
    %31 = arith.mulf %26, %30 : vector<1x8x8xf32>
    "tpu.trace_start"() <{level = 10 : i32, message = "bqk,bkd->bqd"}> : () -> ()
    %cst_8 = arith.constant dense<0.000000e+00> : vector<1x8x16xf32>
    %32 = tpu.matmul %31, %8, %cst_8 {dimension_numbers = #tpu.dot_dimension_numbers<[2], [1], [1], [2], [0, 0, 0, 1, 1, 2], [0], [0]>} : vector<1x8x8xf32>, vector<1x8x16xf32>, vector<1x8x16xf32> -> vector<1x8x16xf32>
    "tpu.trace_stop"() : () -> ()
    %33 = vector.extract_strided_slice %32 {offsets = [0, 0, 0], sizes = [1, 1, 16], strides = [1, 1, 1]} : vector<1x8x16xf32> to vector<1x1x16xf32>
    %c0_9 = arith.constant 0 : index
    %c0_10 = arith.constant 0 : index
    %c0_11 = arith.constant 0 : index
    %34 = vector.load %arg3[%c0_9, %c0_10, %c0_11] : memref<1x1x128xf32, #tpu.memory_space<vmem>>, vector<1x1x16xf32>
    tpu.vector_store %arg3[%c0_9, %c0_10, %c0_11], %33 {strides = array<i32>} : memref<1x1x128xf32, #tpu.memory_space<vmem>>, vector<1x1x16xf32>,
    %35 = vector.extract_strided_slice %32 {offsets = [0, 1, 0], sizes = [1, 1, 16], strides = [1, 1, 1]} : vector<1x8x16xf32> to vector<1x1x16xf32>
    %c0_12 = arith.constant 0 : index
    %c0_13 = arith.constant 0 : index
    %c16 = arith.constant 16 : index
    %36 = vector.load %arg3[%c0_12, %c0_13, %c16] : memref<1x1x128xf32, #tpu.memory_space<vmem>>, vector<1x1x16xf32>
    tpu.vector_store %arg3[%c0_12, %c0_13, %c16], %35 {strides = array<i32>} : memref<1x1x128xf32, #tpu.memory_space<vmem>>, vector<1x1x16xf32>,
    %37 = vector.extract_strided_slice %32 {offsets = [0, 2, 0], sizes = [1, 1, 16], strides = [1, 1, 1]} : vector<1x8x16xf32> to vector<1x1x16xf32>
    %c0_14 = arith.constant 0 : index
    %c0_15 = arith.constant 0 : index
    %c32 = arith.constant 32 : index
    %38 = vector.load %arg3[%c0_14, %c0_15, %c32] : memref<1x1x128xf32, #tpu.memory_space<vmem>>, vector<1x1x16xf32>
    tpu.vector_store %arg3[%c0_14, %c0_15, %c32], %37 {strides = array<i32>} : memref<1x1x128xf32, #tpu.memory_space<vmem>>, vector<1x1x16xf32>,
    %39 = vector.extract_strided_slice %32 {offsets = [0, 3, 0], sizes = [1, 1, 16], strides = [1, 1, 1]} : vector<1x8x16xf32> to vector<1x1x16xf32>
    %c0_16 = arith.constant 0 : index
    %c0_17 = arith.constant 0 : index
    %c48 = arith.constant 48 : index
    %40 = vector.load %arg3[%c0_16, %c0_17, %c48] : memref<1x1x128xf32, #tpu.memory_space<vmem>>, vector<1x1x16xf32>
    tpu.vector_store %arg3[%c0_16, %c0_17, %c48], %39 {strides = array<i32>} : memref<1x1x128xf32, #tpu.memory_space<vmem>>, vector<1x1x16xf32>,
    %41 = vector.extract_strided_slice %32 {offsets = [0, 4, 0], sizes = [1, 1, 16], strides = [1, 1, 1]} : vector<1x8x16xf32> to vector<1x1x16xf32>
    %c0_18 = arith.constant 0 : index
    %c0_19 = arith.constant 0 : index
    %c64 = arith.constant 64 : index
    %42 = vector.load %arg3[%c0_18, %c0_19, %c64] : memref<1x1x128xf32, #tpu.memory_space<vmem>>, vector<1x1x16xf32>
    tpu.vector_store %arg3[%c0_18, %c0_19, %c64], %41 {strides = array<i32>} : memref<1x1x128xf32, #tpu.memory_space<vmem>>, vector<1x1x16xf32>,
    %43 = vector.extract_strided_slice %32 {offsets = [0, 5, 0], sizes = [1, 1, 16], strides = [1, 1, 1]} : vector<1x8x16xf32> to vector<1x1x16xf32>
    %c0_20 = arith.constant 0 : index
    %c0_21 = arith.constant 0 : index
    %c80 = arith.constant 80 : index
    %44 = vector.load %arg3[%c0_20, %c0_21, %c80] : memref<1x1x128xf32, #tpu.memory_space<vmem>>, vector<1x1x16xf32>
    tpu.vector_store %arg3[%c0_20, %c0_21, %c80], %43 {strides = array<i32>} : memref<1x1x128xf32, #tpu.memory_space<vmem>>, vector<1x1x16xf32>,
    %45 = vector.extract_strided_slice %32 {offsets = [0, 6, 0], sizes = [1, 1, 16], strides = [1, 1, 1]} : vector<1x8x16xf32> to vector<1x1x16xf32>
    %c0_22 = arith.constant 0 : index
    %c0_23 = arith.constant 0 : index
    %c96 = arith.constant 96 : index
    %46 = vector.load %arg3[%c0_22, %c0_23, %c96] : memref<1x1x128xf32, #tpu.memory_space<vmem>>, vector<1x1x16xf32>
    tpu.vector_store %arg3[%c0_22, %c0_23, %c96], %45 {strides = array<i32>} : memref<1x1x128xf32, #tpu.memory_space<vmem>>, vector<1x1x16xf32>,
    %47 = vector.extract_strided_slice %32 {offsets = [0, 7, 0], sizes = [1, 1, 16], strides = [1, 1, 1]} : vector<1x8x16xf32> to vector<1x1x16xf32>
    %c0_24 = arith.constant 0 : index
    %c0_25 = arith.constant 0 : index
    %c112 = arith.constant 112 : index
    %48 = vector.load %arg3[%c0_24, %c0_25, %c112] : memref<1x1x128xf32, #tpu.memory_space<vmem>>, vector<1x1x16xf32>
    tpu.vector_store %arg3[%c0_24, %c0_25, %c112], %47 {strides = array<i32>} : memref<1x1x128xf32, #tpu.memory_space<vmem>>, vector<1x1x16xf32>,
    return
  }
  func.func @transform_0(%arg0: i32) -> (i32, i32) {
    %c0_i32 = arith.constant 0 : i32
    %c0_i32_0 = arith.constant 0 : i32
    return %arg0, %c0_i32 : i32, i32
  }
  func.func @transform_1(%arg0: i32) -> (i32, i32) {
    %c0_i32 = arith.constant 0 : i32
    %c0_i32_0 = arith.constant 0 : i32
    %c0_i32_1 = arith.constant 0 : i32
    return %c0_i32, %c0_i32_0 : i32, i32
  }
  func.func @transform_2(%arg0: i32) -> (i32, i32, i32) {
    %c0_i32 = arith.constant 0 : i32
    %c0_i32_0 = arith.constant 0 : i32
    %c0_i32_1 = arith.constant 0 : i32
    return %arg0, %c0_i32, %c0_i32_0 : i32, i32, i32
  }
}

</mosaic_0001>

<bundles_post_ra>
// kernel: tpu_custom_call.1
= control target key start
LH: loop header
LB: loop body
LE: loop exit
PB: predicated region body
PF: predicated region fallthrough
CT: control target
= control target key end

     0   :  { %7 = vsyncpa [#allocation3], 0  ;;  %s1007_s0 = inlined_call_operand.hbm [shape: f32[16,32], index: 0, kind: input, shape index: {}]   ;;  %s1008_s1 = inlined_call_operand.hbm [shape: f32[32,48], index: 1, kind: input, shape index: {}]   ;;  %s1009_s2 = inlined_call_operand.hbm [shape: f32[2,1,128], index: 2, kind: output, shape index: {}]  }
   0x1   :  { %9 = vsyncpa [#allocation3 + $0x1], 0 }
   0x2   :  { %10 = vsyncpa [#allocation6], 0 }
   0x3   :  { %11 = vsyncpa [#allocation4], 0 }
   0x4   :  { %13 = vsyncpa [#allocation4 + $0x1], 0  ;;  %s827_s9 = smov 0   ;;  %s829_s10 = smov 0  }
   0x5   :  { %s831_s11 = smov 0   ;;  %s833_s12 = smov 0  }
   0x6 LB: > { %s848_s13 = sadd.s32 4294967295, %s796_s12   ;;  %s555_s14 = sadd.s32 4294967294, %s796_s12   ;;  %s796_s12 = sphi %s833_s12, %s1031_s12   ;;  %s792_s11 = sphi %s831_s11, %s1030_s11   ;;  %s788_s10 = sphi %s829_s10, %s1029_s10   ;;  %s784_s9 = sphi %s827_s9, %s1028_s9  }
   0x7   : > { %p39_p0 = scmp.ne.s32.totalorder %s788_s10, %s784_s9  ;;  %p1010_p1 = scmp.eq.s32.totalorder %s848_s13, 0 }
   0x8   : > { %p90_p3 = scmp.eq.s32.totalorder %s555_s14, 1  ;;  %p556_p5 = scmp.ge.s32.totalorder %s796_s12, 1 }
   0x9   : > { %p857_p4 = por %p1010_p1, %p39_p0  ;;  %p97_p7 = scmp.lt.s32.totalorder %s796_s12, 3 }
   0xa   : > { %p862_p6 = por %p90_p3, %p39_p0  ;;  %s798_s18 = smov [#allocation5]  }
   0xb   : > { %s1014_s15 = scalar_select %p857_p4, 1, 0 }
   0xc   : > { %s1015_s16 = scalar_select %p862_p6, 1, 0 }
   0xd   : > { %p867_p8 = pnand %p556_p5, %p97_p7  ;;  %s109_s19 = sshll.u32 %s798_s18, 4  ;;  %s110_s19 = int_to_ptr.vmem [resolvable:$true] %s109_s19 }
   0xe   : > { %s881_s21 = sadd.s32 1, %s796_s12   ;;  %s26_s22 = sadd.s32 1, %s792_s11 }
   0xf   : > { %s1016_s17 = scalar_select %p867_p8, 1, 0 }
  0x10   : > { %p610_p9 = pneg %p867_p8  ;;  %s23_s23 = ssub.s32 %s796_s12, %s881_s21 }
  0x11   : > { %s685_s24 = scalar_lea.vmem %s110_s19, 512  ;;  %p693_p5 = scmp.lt.s32.totalorder %s110_s19, %s110_s19 }
  0x12   : > { %p876_p11 = pnand %p610_p9, %p1010_p1  ;;  %p686_p13 = scmp.ne.s32.totalorder %s110_s19, %s685_s24 }
  0x13   : > { %p694_p7 = scmp.lt.s32.totalorder %s685_s24, %s685_s24 }
  0x14   : > { %p676_p12 = pneg %p876_p11 }
  0x15   : > { %p695_p10 = por %p694_p7, %p693_p5 }
  0x16   : > { %p688_p0 = pnand %p686_p13, %p676_p12 }
  0x18   : > { %p689_p3 = pneg %p688_p0 }
  0x1a   : > { %p696_p2 = pnand %p695_p10, %p689_p3 }
  0x1c   : > { %699 = shalt.err (!%p696_p2)
}
  0x1d   : > { %s799_s25 = smov 128   ;;  %s800_s26 = smov 8  }
  0x1e   : > { %613 = dma.hbm_to_vmem [thread:$0]  (!%p876_p11), %s1008_s1, 512, %s110_s19, [#allocation6], %s799_s25, %s799_s25, %s800_s26  }
  0x1f   : > { %p24_p9 = scmp.eq.s32.totalorder %s23_s23, 0  ;;  %p33_p12 = scmp.ne.s32.totalorder %s792_s11, %s788_s10 }
  0x20   : > { %p34_p10 = scmp.eq.s32.totalorder %s796_s12, 0  ;;  %p623_p2 = scmp.lt.s32.totalorder %s796_s12, 2 }
  0x21   : > { %s898_s29 = scalar_select %p24_p9, %s792_s11, %s26_s22  }
  0x22   : > { %p35_p13 = por %p34_p10, %p33_p12  ;;  %p1018_p0 = scmp.eq.s32.totalorder %s848_s13, 1 }
  0x23   : > { %s123_s3 = sand.u32 1, %s792_s11   ;;  %s560_s4 = sshll.u32 %s796_s12, 7 }
  0x24   : > { %p902_p3 = por %p1018_p0, %p33_p12  ;;  %s559_s5 = sshll.u32 %s123_s3, 3 }
  0x25   : > { %s911_s8 = scalar_lea.hbm %s1007_s0, %s560_s4  ;;  %s127_s14 = scalar_lea.vmem [#allocation2], %s559_s5 }
  0x26   : > { %s1019_s30 = scalar_select %p902_p3, 1, 0 }
  0x27   : > { %s134_s18 = sshll.u32 %s127_s14, 4  ;;  %p913_p11 = pnand %p623_p2, %p35_p13  ;;  %s135_s18 = int_to_ptr.vmem [resolvable:$true] %s134_s18 }
  0x28   : > { %s124_s20 = scalar_lea.sflag [#allocation3], %s123_s3  ;;  %s700_s22 = scalar_lea.hbm %s911_s8, 128 }
  0x29   : > { %p701_p5 = scmp.ne.s32.totalorder %s911_s8, %s700_s22  ;;  %p702_p7 = pneg %p913_p11 }
  0x2a   : > { %s705_s25 = scalar_lea.hbm %s1007_s0, 256  ;;  %p706_p10 = scmp.lt.s32.totalorder %s911_s8, %s1007_s0 }
  0x2b   : > { %p703_p9 = pnand %p702_p7, %p701_p5  ;;  %p707_p2 = scmp.lt.s32.totalorder %s705_s25, %s700_s22 }
  0x2d   : > { %p704_p12 = pneg %p703_p9  ;;  %p708_p13 = por %p707_p2, %p706_p10 }
  0x2f   : > { %p709_p0 = pnand %p708_p13, %p704_p12 }
  0x31   : > { %712 = shalt.err (!%p709_p0)
}
  0x32   : > { %s713_s28 = scalar_lea.vmem %s135_s18, 128  ;;  %s801_s3 = smov [#allocation2]  }
  0x33   : > { %p714_p1 = scmp.ne.s32.totalorder %s135_s18, %s713_s28  ;;  %s718_s4 = sshll.u32 %s801_s3, 4  ;;  %s719_s4 = int_to_ptr.vmem [resolvable:$false] %s718_s4 }
  0x34   : > { %s720_s5 = scalar_lea.vmem %s719_s4, 256  ;;  %p721_p5 = scmp.lt.s32.totalorder %s135_s18, %s719_s4 }
  0x35   : > { %p716_p6 = pnand %p714_p1, %p702_p7  ;;  %p722_p9 = scmp.lt.s32.totalorder %s720_s5, %s713_s28 }
  0x37   : > { %p717_p3 = pneg %p716_p6  ;;  %p723_p4 = por %p722_p9, %p721_p5 }
  0x39   : > { %p724_p8 = pnand %p723_p4, %p717_p3 }
  0x3b   : > { %727 = shalt.err (!%p724_p8)
}
  0x3c   : > { %617 = dma.hbm_to_vmem [thread:$0]  (!%p913_p11), %s911_s8, 128, %s135_s18, %s124_s20  }
  0x3d   : > { %p1021_p12 = scmp.ne.s32.totalorder %s1016_s17, 0 }
  0x3e   : > { %s934_s6 = sand.u32 (!%p1021_p12), 1, %s788_s10   ;;  %p1022_p1 = scmp.ne.s32.totalorder (!%p1021_p12), %s1014_s15, 0 }
  0x3f   : > { %143 = sbr.rel (%p1021_p12) target bundleno = 1242 (0x4da), region = 28  ;;  %s562_s7 = sshll.u32 (!%p1021_p12), %s934_s6, 3 }
  0x40   : > { %s146_s14 = scalar_lea.sflag (!%p1021_p12), [#allocation3], %s934_s6  ;;  %s149_s22 = scalar_lea.vmem (!%p1021_p12), [#allocation2], %s562_s7 }
  0x44   : > { %771 = dma.done.wait (%p1022_p1), %s146_s14, 128  }
  0x45   : > { %773 = vsyncadd (%p1022_p1), %s146_s14, 4294967168  ;;  %p1023_p4 = scmp.eq.s32.totalorder %s848_s13, 0 }
  0x47   : > { %775 = dma.done.wait (%p1023_p4), [#allocation6], 512   ;;  %p1024_p6 = pmov %p1023_p4 }
  0x48   : > { %v802_v0 = vmov 0.0   ;;  %vm803_vm0 = vmmov 0   ;;  %v177_v1 = vld [vmem:[#allocation5 + $0x18] sm:$0xff]  ;;  %v176_v2 = vld [vmem:[#allocation5 + $0x10] sm:$0xff]  ;;  %v175_v3 = vld [vmem:[#allocation5 + $0x8] sm:$0xff]  ;;  %vm178_vm1 = vcmask 261120   ;;  %v331_v9 = vlaneseq }
  0x49   : > { %777 = vsyncadd (%p1024_p6), [#allocation6], 4294966784  ;;  %581 = vmatprep.subr.mxu0 %v802_v0  ;;  %589 = vmatprep.mubr.msk.f32.mxu0 %vm803_vm0, %v802_v0  ;;  %v174_v4 = vld [vmem:[#allocation5] sm:$0xff]  ;;  %v173_v5 = vld [vmem:[%s149_s22] sm:$0xff]  ;;  %s804_s15 = smov 112   ;;  %vm255_vm2 = vcmask 130048  }
  0x4a   : > { %592 = vmatprep.subr.mxu1 %v802_v0  ;;  %594 = vmatprep.mubr.msk.f32.mxu1 %vm803_vm0, %v802_v0  ;;  %v332_v10 = vshrl.u32 %v331_v9, 7  ;;  %v334_v11 = vand.u32 127, %v331_v9  ;;  %vm340_vm6 = vcmask 64512   ;;  %s805_s17 = smov 96   ;;  %vm428_vm7 = vcmask 122880   ;;  %s806_s8 = smov 80  }
  0x4b   : > { %582 = vmatpush3.msra.mxu0 %v177_v1  ;;  %s807_s18 = smov 16   ;;  %s954_s19 = scalar_lea.vmem [#allocation7], %s934_s6  ;;  %vm434_vm8 = vcmask 255105   ;;  %vm439_vm9 = vcmask 387330   ;;  %vm444_vm10 = vcmask 519555   ;;  %vm449_vm11 = vcmask 651780  }
  0x4c   : > { %583 = vmatprep.subr.mxu0 %v802_v0  ;;  %v567_v12 = vadd.s32 4294967293, %v332_v10  ;;  %vm335_vm3 = vcmp.le.s32.totalorder %v334_v11, %v332_v10  ;;  %s808_s20 = smov 32   ;;  %s809_s23 = smov 48   ;;  %vm454_vm12 = vcmask 784005   ;;  %vm459_vm13 = vcmask 916230  }
  0x4d   : > { %584 = vmatpush3.msra.mxu0 %v176_v2  ;;  %s810_s24 = smov 64   ;;  %s569_s25 = sshll.u32 %s848_s13, 4  ;;  %vm464_vm14 = vcmask 1048455  }
  0x4e   : > { %585 = vmatprep.subr.mxu0 %v802_v0  ;;  %vm337_vm4 = vcmp.gt.s32.totalorder %v334_v11, %v567_v12  ;;  %s479_s26 = sshll.u32 %s954_s19, 4  ;;  %s969_s3 = scalar_lea.hbm %s1009_s2, %s569_s25  ;;  %s480_s26 = int_to_ptr.vmem [resolvable:$true] %s479_s26 }
  0x4f   : > { %586 = vmatpush3.msra.mxu0 %v175_v3  ;;  %vm338_vm5 = vmand %vm335_vm3, %vm337_vm4  ;;  %s467_s4 = scalar_lea.sflag [#allocation4], %s934_s6  ;;  %s728_s5 = scalar_lea.vmem %s480_s26, 16 }
  0x50   : > { %587 = vmatprep.subr.mxu0 %v802_v0  ;;  %p729_p8 = scmp.ne.s32.totalorder %s480_s26, %s728_s5  ;;  %p1025_p3 = scmp.ne.s32.totalorder %s1019_s30, 0 }
  0x51   : > { %588 = vmatpush3.msra.mxu0 %v174_v4  ;;  %s811_s7 = smov [#allocation7]  }
  0x52   : > { %590 = vmatmul.mubr.msk.f32.vlgmr.msra.gmra.mxu0 %vm178_vm1, %v173_v5  ;;  %p730_p11 = pnand %p729_p8, %p1025_p3  ;;  %s732_s14 = sshll.u32 %s811_s7, 4  ;;  %s733_s14 = int_to_ptr.vmem [resolvable:$false] %s732_s14 }
  0x53   : > { %s734_s13 = scalar_lea.vmem %s733_s14, 32  ;;  %p735_p10 = scmp.lt.s32.totalorder %s480_s26, %s733_s14 }
  0x54   : > { %p731_p7 = pneg %p730_p11  ;;  %p736_p2 = scmp.lt.s32.totalorder %s734_s13, %s728_s5 }
  0x56   : > { %p737_p13 = por %p736_p2, %p735_p10 }
  0x58   : > { %p738_p0 = pnand %p737_p13, %p731_p7 }
 0x112   : > { %v248_v6 = vpop.f32.mrf.mxu0 }
 0x113   : > { %253 = vrot.lane.b32.xlu0 %v248_v6, %s804_s15 }
 0x114   : > { %v591_v7 = vpop.f32.mrf.mxu0 }
 0x185   : > { %v254_v8 = vpop.permute.xlu0 %253 }
 0x186   : > { %593 = vmatpush3.xpose.msk.msra.mxu1 %vm255_vm2, %v254_v8 }
 0x187   : > { %597 = vmatprep.subr.mxu1 %v802_v0 }
 0x189   : > { %595 = vmatmul.mubr.msk.f32.vlgmr.msra.gmra.mxu1 %vm255_vm2, %v248_v6 }
 0x18a   : > { %599 = vmatprep.mubr.msk.f32.mxu1 %vm803_vm0, %v802_v0 }
 0x249   : > { %v326_v13 = vpop.f32.mrf.mxu1 }
 0x24a   : > { %v330_v14 = vmul.f32 0.25, %v326_v13 }
 0x24b   : > { %v596_v15 = vpop.f32.mrf.mxu1 }
 0x24c   : > { %v339_v16 = vsel %vm338_vm5, %v330_v14, -1e+30 }
 0x24d   : > { %v341_v17 = vsel %vm340_vm6, %v339_v16, -inf }
 0x24e   : > { %342 = vmax.xlane.f32.xlu0 %v341_v17 }
 0x2d7   : > { %v343_v18 = vpop.xlane.xlu0 %342 }
 0x2d8   : > { %v344_v19 = vsub.f32 %v339_v16, %v343_v18 }
 0x2da   : > { %v345_v20 = vmul.f32 1.442695, %v344_v19 }
 0x2dc   : > { %670 = vpow2.f32 %v345_v20 }
 0x2e9   : > { %v671_v21 = vpop.eup %670 }
 0x2ea   : > { %v347_v22 = vsel %vm340_vm6, %v671_v21, 0.0 }
 0x2eb   : > { %348 = vadd.xlane.f32.xlu1 %v347_v22 }
 0x2fc   : > { %352 = vrot.lane.b32.xlu1 %v248_v6, %s805_s17 }
 0x374   : > { %v349_v23 = vpop.xlane.xlu1 %348 }
 0x375   : > { %672 = vrcp.f32 %v349_v23 }
 0x378   : > { %v353_v24 = vpop.permute.xlu1 %352 }
 0x379   : > { %598 = vmatpush3.msra.mxu1 %v353_v24 }
 0x382   : > { %v673_v25 = vpop.eup %672 }
 0x383   : > { %v351_v26 = vmul.f32 %v673_v25, %v671_v21 }
 0x385   : > { %600 = vmatmul.mubr.msk.f32.vlgmr.msra.gmra.mxu1 %vm340_vm6, %v351_v26 }
 0x445   : > { %v424_v27 = vpop.f32.mrf.mxu1 }
 0x446   : > { %451 = vrot.lane.b32.xlu0 %v424_v27, %s806_s8  ;;  %431 = vrot.lane.b32.xlu1 %v424_v27, %s807_s18  ;;  %429 = vst.msk [vmem:[%s954_s19] sm:$0x1] %vm428_vm7, %v424_v27 }
 0x447   : > { %v601_v28 = vpop.f32.mrf.mxu1 }
 0x44a   : > { %436 = vrot.lane.b32.xlu1 %v424_v27, %s808_s20 }
 0x44e   : > { %441 = vrot.lane.b32.xlu1 %v424_v27, %s809_s23 }
 0x452   : > { %446 = vrot.lane.b32.xlu1 %v424_v27, %s810_s24 }
 0x456   : > { %456 = vrot.lane.b32.xlu1 %v424_v27, %s805_s17 }
 0x45a   : > { %461 = vrot.lane.b32.xlu1 %v424_v27, %s804_s15 }
 0x4b8   : > { %v432_v29 = vpop.permute.xlu1 %431  ;;  %v452_v33 = vpop.permute.xlu0 %451 }
 0x4b9   : > { %435 = vst.msk [vmem:[%s954_s19 - $0x1] sm:$0x2] %vm434_vm8, %v432_v29 }
 0x4bc   : > { %v437_v30 = vpop.permute.xlu1 %436 }
 0x4bd   : > { %440 = vst.msk [vmem:[%s954_s19 - $0x2] sm:$0x4] %vm439_vm9, %v437_v30 }
 0x4c0   : > { %v442_v31 = vpop.permute.xlu1 %441 }
 0x4c1   : > { %445 = vst.msk [vmem:[%s954_s19 - $0x3] sm:$0x8] %vm444_vm10, %v442_v31 }
 0x4c4   : > { %v447_v32 = vpop.permute.xlu1 %446 }
 0x4c5   : > { %450 = vst.msk [vmem:[%s954_s19 - $0x4] sm:$0x10] %vm449_vm11, %v447_v32 }
 0x4c6   : > { %455 = vst.msk [vmem:[%s954_s19 - $0x5] sm:$0x20] %vm454_vm12, %v452_v33 }
 0x4c8   : > { %v457_v34 = vpop.permute.xlu1 %456 }
 0x4c9   : > { %460 = vst.msk [vmem:[%s954_s19 - $0x6] sm:$0x40] %vm459_vm13, %v457_v34 }
 0x4cc   : > { %v462_v35 = vpop.permute.xlu1 %461 }
 0x4cd   : > { %465 = vst.msk [vmem:[%s954_s19 - $0x7] sm:$0x80] %vm464_vm14, %v462_v35 }
 0x4ce   : > { %741 = shalt.err (!%p738_p0)
}
 0x4cf   : > { %s742_s22 = scalar_lea.hbm %s969_s3, 16  ;;  %s746_s17 = scalar_lea.hbm %s1009_s2, 32 }
 0x4d0   : > { %p743_p5 = scmp.ne.s32.totalorder %s969_s3, %s742_s22  ;;  %p747_p1 = scmp.lt.s32.totalorder %s969_s3, %s1009_s2 }
 0x4d1   : > { %p748_p4 = scmp.lt.s32.totalorder %s746_s17, %s742_s22 }
 0x4d2   : > { %p744_p9 = pnand %p743_p5, %p1025_p3 }
 0x4d3   : > { %p749_p6 = por %p748_p4, %p747_p1 }
 0x4d4   : > { %p745_p12 = pneg %p744_p9 }
 0x4d6   : > { %p750_p8 = pnand %p749_p6, %p745_p12 }
 0x4d8   : > { %753 = shalt.err (!%p750_p8)
}
 0x4d9   : > { %608 = dma.vmem_to_hbm [thread:$0]  (%p1025_p3), %s480_s26, 16, %s969_s3, %s467_s4  }
 0x4da PF: > { %s491_s19 = sand.u32 1, %s784_s9   ;;  %p1026_p11 = scmp.ne.s32.totalorder %s1015_s16, 0 }
 0x4db   : > { %p1027_p7 = scmp.ge.s32.totalorder %s796_s12, 2  ;;  %s492_s20 = scalar_lea.sflag [#allocation4], %s491_s19 }
 0x4dd   : > { %p619_p10 = pnand %p1027_p7, %p1026_p11 }
 0x4df   : > { %p620_p2 = pneg %p619_p10 }
 0x4e1   : > { %779 = dma.done.wait (%p620_p2), %s492_s20, 16  }
 0x4e2   : > { %781 = vsyncadd (%p620_p2), %s492_s20, 4294967280  ;;  %p16_p13 = scmp.ge.s32.totalorder %s881_s21, 4   ;;  %s1028_s9 = smov %s788_s10 }
 0x4e3   : > { %s1029_s10 = smov %s792_s11  ;;  %s1030_s11 = smov %s898_s29 }
 0x4e4   : > { %s1031_s12 = smov %s881_s21  ;;  %18 = sbr.rel (!%p16_p13) target bundleno = 6 (0x6), region = 77 }
 0x4e9   :  { %496 = vsyncpa [#allocation3], 1 }
 0x4ea   :  { %498 = vsyncpa [#allocation3 + $0x1], 1 }
 0x4eb   :  { %499 = vsyncpa [#allocation6], 1 }
 0x4ec   :  { %500 = vsyncpa [#allocation4], 1 }
 0x4ed   :  { %502 = vsyncpa [#allocation4 + $0x1], 1 }

</bundles_post_ra>
